<compile_context>
chip_gen: v6e
topology: v6e:2x2x1
jax: 0.10.0
libtpu: 0.0.40
codegen_flags: <defaults>
</compile_context>

<pallas_src>
import functools

import jax
import jax.numpy as jnp
from jax.experimental import pallas as pl
from jax.experimental.pallas import tpu as pltpu


def _round_up(x: int, m: int) -> int:
    return (x + m - 1) // m * m


# ---------------------------------------------------------------------------
# Fused kernel: one TILE_M-row slab of the flattened (B*T) row axis.
#   h   = relu(s @ W1s + u @ W1u + b1)          (dropout = identity, eval)
#   y   = h @ W2 + b2
#   out = (y - mean) * rsqrt(var + eps) * gamma + beta
# ---------------------------------------------------------------------------
def _encoder_kernel(s_ref, u_ref, w1s_ref, w1u_ref, b1_ref, w2_ref, ln_ref,
                    o_ref, *, eps: float):
    # Fused concat: x @ W1 == s @ W1[:S, :] + u @ W1[S:, :]
    h = jnp.dot(s_ref[...], w1s_ref[...], preferred_element_type=jnp.float32)
    h = h + jnp.dot(u_ref[...], w1u_ref[...],
                    preferred_element_type=jnp.float32)
    h = jnp.maximum(h + b1_ref[...], 0.0)            # ReLU (dropout == id)

    # .astype is a no-op for matching dtypes (f32 weights); avoids a mixed-
    # dtype matmul if bf16 weights are ever supplied.
    y = jnp.dot(h.astype(w2_ref.dtype), w2_ref[...],
                preferred_element_type=jnp.float32)
    y = y + ln_ref[0:1, :]                            # b2

    # One-pass LayerNorm statistics: var = E[y^2] - mean^2.
    n = y.shape[-1]
    mean = jnp.sum(y, axis=-1, keepdims=True) * (1.0 / n)
    ex2 = jnp.sum(y * y, axis=-1, keepdims=True) * (1.0 / n)
    var = jnp.maximum(ex2 - mean * mean, 0.0)
    inv = jax.lax.rsqrt(var + eps)

    o_ref[...] = ((y - mean) * inv * ln_ref[1:2, :]   # gamma
                  + ln_ref[2:3, :]                    # beta
                  ).astype(o_ref.dtype)


# ---------------------------------------------------------------------------
# Wrapper: (B,T)-order flatten -> tiled pallas_call -> reshape (no transpose).
# ---------------------------------------------------------------------------
def dynamics_feature_encoder(s_hist, u_hist, params, *, tile_m: int = 512,
                             eps: float = 1e-5):
    w1, b1 = params["w1"], params["b1"]
    w2, b2 = params["w2"], params["b2"]
    gamma, beta = params["gamma"], params["beta"]

    T, B, state_dim = s_hist.shape
    control_dim = u_hist.shape[-1]
    hidden_dim = w1.shape[1]
    feature_dim = w2.shape[1]

    # Move the final .transpose(0,1) to the (narrow) input side: flatten rows
    # in (B, T) order so the kernel emits (B*T, F) == final layout.
    M = B * T
    s2 = jnp.transpose(s_hist, (1, 0, 2)).reshape(M, state_dim)
    u2 = jnp.transpose(u_hist, (1, 0, 2)).reshape(M, control_dim)

    # Split W1 once in the wrapper (fused concat in the kernel).
    w1_s = w1[:state_dim]
    w1_u = w1[state_dim:]
    b1_2d = b1.reshape(1, hidden_dim)
    # Pack b2 / gamma / beta into a single (3, F) operand.
    ln_pack = jnp.stack([b2, gamma, beta], axis=0)

    # ---- Row-tile selection: VMEM budget + >=2 grid steps (v7x megacore) ----
    itemsize = 4  # f32 compute path
    weight_bytes = 2 * itemsize * (          # default double-buffered residency
        (state_dim + control_dim) * hidden_dim + hidden_dim * feature_dim
        + hidden_dim + 3 * feature_dim)
    per_row_bytes = itemsize * (
        2 * (state_dim + control_dim + feature_dim)  # double-buffered in/out rows
        + hidden_dim + feature_dim)                  # live f32 intermediates
    budget = 12 * 1024 * 1024                        # safe on v5e/v6e/v7x
    tile_cap = max(8, ((budget - weight_bytes) // per_row_bytes) // 8 * 8)

    m_pad = _round_up(M, 8)
    tile = min(tile_m, tile_cap, m_pad)
    tile = max(8, tile - tile % 8)
    # Keep >=2 grid steps when there are enough rows (keeps both v7x TCs busy).
    if m_pad // tile < 2 and m_pad >= 16:
        tile = max(8, _round_up(m_pad // 2, 8))
    grid_m = pl.cdiv(m_pad, tile)
    m_grid = grid_m * tile
    if m_grid != M:
        # Only the narrow inputs are padded; padded rows are bias-only rows
        # through LayerNorm (eps-protected) and are sliced off below — keep
        # the [:M] slice.
        s2 = jnp.pad(s2, ((0, m_grid - M), (0, 0)))
        u2 = jnp.pad(u2, ((0, m_grid - M), (0, 0)))

    out = pl.pallas_call(
        functools.partial(_encoder_kernel, eps=eps),
        out_shape=jax.ShapeDtypeStruct((m_grid, feature_dim), s_hist.dtype),
        grid=(grid_m,),
        in_specs=[
            pl.BlockSpec((tile, state_dim), lambda i: (i, 0)),          # s rows
            pl.BlockSpec((tile, control_dim), lambda i: (i, 0)),        # u rows
            pl.BlockSpec((state_dim, hidden_dim), lambda i: (0, 0)),    # W1[:S]
            pl.BlockSpec((control_dim, hidden_dim), lambda i: (0, 0)),  # W1[S:]
            pl.BlockSpec((1, hidden_dim), lambda i: (0, 0)),            # b1
            pl.BlockSpec((hidden_dim, feature_dim), lambda i: (0, 0)),  # W2
            pl.BlockSpec((3, feature_dim), lambda i: (0, 0)),           # b2/g/b
        ],
        out_specs=pl.BlockSpec((tile, feature_dim), lambda i: (i, 0)),
        compiler_params=pltpu.CompilerParams(
            dimension_semantics=("parallel",),
            vmem_limit_bytes=32 * 1024 * 1024,
        ),
    )(s2, u2, w1_s, w1_u, b1_2d, w2, ln_pack)

    # Already in (B, T, F) order — no post-kernel transpose.
    return out[:M].reshape(B, T, feature_dim)


# ---------------------------------------------------------------------------
# Thin module-like wrapper mirroring the PyTorch class (eval-mode forward).
# ---------------------------------------------------------------------------
class DynamicsFeatureEncoder:
    def __init__(self, state_dim, control_dim, feature_dim, hidden_dim=None,
                 dropout=0.1, key=None):
        hidden_dim = hidden_dim or feature_dim * 2
        in_dim = state_dim + control_dim
        if key is None:
            key = jax.random.PRNGKey(0)
        k1, k2, k3, k4 = jax.random.split(key, 4)
        self.dropout = dropout  # unused in eval-mode forward
        # NOTE: weights are stored (in, out); loading PyTorch nn.Linear
        # checkpoints requires transposing their (out, in) weight matrices.
        self.params = dict(
            w1=jax.random.uniform(k1, (in_dim, hidden_dim), jnp.float32,
                                  -1.0, 1.0) / jnp.sqrt(in_dim),
            b1=jax.random.uniform(k2, (hidden_dim,), jnp.float32,
                                  -1.0, 1.0) / jnp.sqrt(in_dim),
            w2=jax.random.uniform(k3, (hidden_dim, feature_dim), jnp.float32,
                                  -1.0, 1.0) / jnp.sqrt(hidden_dim),
            b2=jax.random.uniform(k4, (feature_dim,), jnp.float32,
                                  -1.0, 1.0) / jnp.sqrt(hidden_dim),
            gamma=jnp.ones((feature_dim,), jnp.float32),
            beta=jnp.zeros((feature_dim,), jnp.float32),
        )

    def __call__(self, s_hist, u_hist):
        return dynamics_feature_encoder(s_hist, u_hist, self.params)


# ---------------------------------------------------------------------------
# Pure-JAX reference (HIGHEST precision) for correctness checking.
# ---------------------------------------------------------------------------
def _encoder_ref(s_hist, u_hist, params, eps: float = 1e-5):
    hi = jax.lax.Precision.HIGHEST
    x = jnp.concatenate([s_hist, u_hist], axis=-1)
    h = jnp.maximum(jnp.dot(x, params["w1"], precision=hi) + params["b1"], 0.0)
    y = jnp.dot(h, params["w2"], precision=hi) + params["b2"]
    mean = jnp.mean(y, axis=-1, keepdims=True)
    var = jnp.mean((y - mean) ** 2, axis=-1, keepdims=True)
    y = (y - mean) / jnp.sqrt(var + eps)
    y = y * params["gamma"] + params["beta"]
    return jnp.transpose(y, (1, 0, 2))


if __name__ == "__main__":
    key = jax.random.PRNGKey(0)
    T, B = 8, 2                       # (seq, batch) — s_hist is (T, B, D)
    state_dim, control_dim = 6, 2
    feature_dim = 128                 # lane-dense output (multiple of 128)
    hidden_dim = 2 * feature_dim

    k_s, k_u, k_mod = jax.random.split(key, 3)
    s_hist = jax.random.normal(k_s, (T, B, state_dim), dtype=jnp.float32)
    u_hist = jax.random.normal(k_u, (T, B, control_dim), dtype=jnp.float32)

    enc = DynamicsFeatureEncoder(state_dim, control_dim, feature_dim,
                                 hidden_dim=hidden_dim, key=k_mod)

    out = jax.block_until_ready(enc(s_hist, u_hist))
    assert out.shape == (B, T, feature_dim), out.shape

    ref = _encoder_ref(s_hist, u_hist, enc.params)
    max_err = float(jnp.max(jnp.abs(out - ref)))
    # Tolerance is deliberately loose: the in-kernel dots use the MXU's
    # default (bf16-pass) precision while the reference uses HIGHEST; real
    # bugs (wrong weights / LN) would give O(1) errors, not ~1e-2.
    assert jnp.allclose(out, ref, atol=3e-2, rtol=3e-2), max_err

    print("KERNEL_OK")
</pallas_src>

<mosaic_0001>
module attributes {stable_mosaic.version = 11 : i64} {
  func.func @_encoder_kernel(%arg0: i32, %arg1: memref<8x6xf32, #tpu.memory_space<vmem>>, %arg2: memref<8x2xf32, #tpu.memory_space<vmem>>, %arg3: memref<6x256xf32, #tpu.memory_space<vmem>>, %arg4: memref<2x256xf32, #tpu.memory_space<vmem>>, %arg5: memref<1x256xf32, #tpu.memory_space<vmem>>, %arg6: memref<256x128xf32, #tpu.memory_space<vmem>>, %arg7: memref<3x128xf32, #tpu.memory_space<vmem>>, %arg8: memref<8x128xf32, #tpu.memory_space<vmem>>) attributes {dimension_semantics = [#tpu.dimension_semantics<parallel>], iteration_bounds = array<i64: 2>, scalar_prefetch = 0 : i64, scratch_operands = 0 : i64, tpu.core_type = #tpu.core_type<tc>, window_params = [{transform_indices = @transform_0, window_bounds = array<i64: 8, 6>}, {transform_indices = @transform_1, window_bounds = array<i64: 8, 2>}, {pipeline_mode = #tpu.pipeline_mode<synchronous>, transform_indices = @transform_2, window_bounds = array<i64: 6, 256>}, {pipeline_mode = #tpu.pipeline_mode<synchronous>, transform_indices = @transform_3, window_bounds = array<i64: 2, 256>}, {pipeline_mode = #tpu.pipeline_mode<synchronous>, transform_indices = @transform_4, window_bounds = array<i64: 1, 256>}, {pipeline_mode = #tpu.pipeline_mode<synchronous>, transform_indices = @transform_5, window_bounds = array<i64: 256, 128>}, {pipeline_mode = #tpu.pipeline_mode<synchronous>, transform_indices = @transform_6, window_bounds = array<i64: 3, 128>}, {transform_indices = @transform_7, window_bounds = array<i64: 8, 128>}]} {
    %c0 = arith.constant 0 : index
    %c0_0 = arith.constant 0 : index
    %0 = vector.load %arg1[%c0, %c0_0] : memref<8x6xf32, #tpu.memory_space<vmem>>, vector<8x6xf32>
    %c0_1 = arith.constant 0 : index
    %c0_2 = arith.constant 0 : index
    %1 = vector.load %arg3[%c0_1, %c0_2] : memref<6x256xf32, #tpu.memory_space<vmem>>, vector<6x256xf32>
    %cst = arith.constant dense<0.000000e+00> : vector<8x256xf32>
    %2 = tpu.matmul %0, %1, %cst {dimension_numbers = #tpu.dot_dimension_numbers<[1], [0], [0], [1], [0, 0, 1, 1], [], []>} : vector<8x6xf32>, vector<6x256xf32>, vector<8x256xf32> -> vector<8x256xf32>
    %c0_3 = arith.constant 0 : index
    %c0_4 = arith.constant 0 : index
    %3 = vector.load %arg2[%c0_3, %c0_4] : memref<8x2xf32, #tpu.memory_space<vmem>>, vector<8x2xf32>
    %c0_5 = arith.constant 0 : index
    %c0_6 = arith.constant 0 : index
    %4 = vector.load %arg4[%c0_5, %c0_6] : memref<2x256xf32, #tpu.memory_space<vmem>>, vector<2x256xf32>
    %cst_7 = arith.constant dense<0.000000e+00> : vector<8x256xf32>
    %5 = tpu.matmul %3, %4, %cst_7 {dimension_numbers = #tpu.dot_dimension_numbers<[1], [0], [0], [1], [0, 0, 1, 1], [], []>} : vector<8x2xf32>, vector<2x256xf32>, vector<8x256xf32> -> vector<8x256xf32>
    %6 = arith.addf %2, %5 : vector<8x256xf32>
    %c0_8 = arith.constant 0 : index
    %c0_9 = arith.constant 0 : index
    %7 = vector.load %arg5[%c0_8, %c0_9] : memref<1x256xf32, #tpu.memory_space<vmem>>, vector<1x256xf32>
    %8 = vector.broadcast %7 : vector<1x256xf32> to vector<8x256xf32>
    %9 = arith.addf %6, %8 : vector<8x256xf32>
    %cst_10 = arith.constant 0.000000e+00 : f32
    %10 = vector.broadcast %cst_10 : f32 to vector<8x256xf32>
    %11 = arith.maximumf %9, %10 : vector<8x256xf32>
    %c0_11 = arith.constant 0 : index
    %c0_12 = arith.constant 0 : index
    %12 = vector.load %arg6[%c0_11, %c0_12] : memref<256x128xf32, #tpu.memory_space<vmem>>, vector<256x128xf32>
    %cst_13 = arith.constant dense<0.000000e+00> : vector<8x128xf32>
    %13 = tpu.matmul %11, %12, %cst_13 {dimension_numbers = #tpu.dot_dimension_numbers<[1], [0], [0], [1], [0, 0, 1, 1], [], []>} : vector<8x256xf32>, vector<256x128xf32>, vector<8x128xf32> -> vector<8x128xf32>
    %c0_14 = arith.constant 0 : index
    %c0_15 = arith.constant 0 : index
    %14 = vector.load %arg7[%c0_14, %c0_15] : memref<3x128xf32, #tpu.memory_space<vmem>>, vector<1x128xf32>
    %15 = vector.broadcast %14 : vector<1x128xf32> to vector<8x128xf32>
    %16 = arith.addf %13, %15 : vector<8x128xf32>
    %cst_16 = arith.constant dense<0.000000e+00> : vector<8xf32>
    %17 = vector.multi_reduction <add>, %16, %cst_16 [1] : vector<8x128xf32> to vector<8xf32>
    %18 = vector.shape_cast %17 : vector<8xf32> to vector<8x1xf32>
    %cst_17 = arith.constant 7.812500e-03 : f32
    %19 = vector.broadcast %cst_17 : f32 to vector<8x1xf32>
    %20 = arith.mulf %18, %19 : vector<8x1xf32>
    %21 = arith.mulf %16, %16 : vector<8x128xf32>
    %cst_18 = arith.constant dense<0.000000e+00> : vector<8xf32>
    %22 = vector.multi_reduction <add>, %21, %cst_18 [1] : vector<8x128xf32> to vector<8xf32>
    %23 = vector.shape_cast %22 : vector<8xf32> to vector<8x1xf32>
    %cst_19 = arith.constant 7.812500e-03 : f32
    %24 = vector.broadcast %cst_19 : f32 to vector<8x1xf32>
    %25 = arith.mulf %23, %24 : vector<8x1xf32>
    %26 = arith.mulf %20, %20 : vector<8x1xf32>
    %27 = arith.subf %25, %26 : vector<8x1xf32>
    %cst_20 = arith.constant 0.000000e+00 : f32
    %28 = vector.broadcast %cst_20 : f32 to vector<8x1xf32>
    %29 = arith.maximumf %27, %28 : vector<8x1xf32>
    %cst_21 = arith.constant 9.99999974E-6 : f32
    %30 = vector.broadcast %cst_21 : f32 to vector<8x1xf32>
    %31 = arith.addf %29, %30 : vector<8x1xf32>
    %32 = math.rsqrt %31 : vector<8x1xf32>
    %33 = vector.broadcast %20 : vector<8x1xf32> to vector<8x128xf32>
    %34 = arith.subf %16, %33 : vector<8x128xf32>
    %35 = vector.broadcast %32 : vector<8x1xf32> to vector<8x128xf32>
    %36 = arith.mulf %34, %35 : vector<8x128xf32>
    %c1 = arith.constant 1 : index
    %c0_22 = arith.constant 0 : index
    %37 = vector.load %arg7[%c1, %c0_22] : memref<3x128xf32, #tpu.memory_space<vmem>>, vector<1x128xf32>
    %38 = vector.broadcast %37 : vector<1x128xf32> to vector<8x128xf32>
    %39 = arith.mulf %36, %38 : vector<8x128xf32>
    %c2 = arith.constant 2 : index
    %c0_23 = arith.constant 0 : index
    %40 = vector.load %arg7[%c2, %c0_23] : memref<3x128xf32, #tpu.memory_space<vmem>>, vector<1x128xf32>
    %41 = vector.broadcast %40 : vector<1x128xf32> to vector<8x128xf32>
    %42 = arith.addf %39, %41 : vector<8x128xf32>
    %c0_24 = arith.constant 0 : index
    %c0_25 = arith.constant 0 : index
    %43 = vector.load %arg8[%c0_24, %c0_25] : memref<8x128xf32, #tpu.memory_space<vmem>>, vector<8x128xf32>
    tpu.vector_store %arg8[%c0_24, %c0_25], %42 {strides = array<i32>} : memref<8x128xf32, #tpu.memory_space<vmem>>, vector<8x128xf32>,
    return
  }
  func.func @transform_0(%arg0: i32) -> (i32, i32) {
    %c0_i32 = arith.constant 0 : i32
    %c0_i32_0 = arith.constant 0 : i32
    return %arg0, %c0_i32 : i32, i32
  }
  func.func @transform_1(%arg0: i32) -> (i32, i32) {
    %c0_i32 = arith.constant 0 : i32
    %c0_i32_0 = arith.constant 0 : i32
    return %arg0, %c0_i32 : i32, i32
  }
  func.func @transform_2(%arg0: i32) -> (i32, i32) {
    %c0_i32 = arith.constant 0 : i32
    %c0_i32_0 = arith.constant 0 : i32
    %c0_i32_1 = arith.constant 0 : i32
    return %c0_i32, %c0_i32_0 : i32, i32
  }
  func.func @transform_3(%arg0: i32) -> (i32, i32) {
    %c0_i32 = arith.constant 0 : i32
    %c0_i32_0 = arith.constant 0 : i32
    %c0_i32_1 = arith.constant 0 : i32
    return %c0_i32, %c0_i32_0 : i32, i32
  }
  func.func @transform_4(%arg0: i32) -> (i32, i32) {
    %c0_i32 = arith.constant 0 : i32
    %c0_i32_0 = arith.constant 0 : i32
    %c0_i32_1 = arith.constant 0 : i32
    return %c0_i32, %c0_i32_0 : i32, i32
  }
  func.func @transform_5(%arg0: i32) -> (i32, i32) {
    %c0_i32 = arith.constant 0 : i32
    %c0_i32_0 = arith.constant 0 : i32
    %c0_i32_1 = arith.constant 0 : i32
    return %c0_i32, %c0_i32_0 : i32, i32
  }
  func.func @transform_6(%arg0: i32) -> (i32, i32) {
    %c0_i32 = arith.constant 0 : i32
    %c0_i32_0 = arith.constant 0 : i32
    %c0_i32_1 = arith.constant 0 : i32
    return %c0_i32, %c0_i32_0 : i32, i32
  }
  func.func @transform_7(%arg0: i32) -> (i32, i32) {
    %c0_i32 = arith.constant 0 : i32
    %c0_i32_0 = arith.constant 0 : i32
    return %arg0, %c0_i32 : i32, i32
  }
}

</mosaic_0001>

<bundles_post_ra>
// kernel: tpu_custom_call.1
= control target key start
LH: loop header
LB: loop body
LE: loop exit
PB: predicated region body
PF: predicated region fallthrough
CT: control target
= control target key end

     0   :  { %12 = vsyncpa [#allocation3], 0  ;;  %s1108_s0 = inlined_call_operand.vmem [shape: f32[16,6], index: 0, kind: input, shape index: {}]   ;;  %s1109_s1 = inlined_call_operand.vmem [shape: f32[16,2], index: 1, kind: input, shape index: {}]   ;;  %s1110_s2 = inlined_call_operand.vmem [shape: f32[6,256], index: 2, kind: input, shape index: {}]   ;;  %s1111_s3 = inlined_call_operand.vmem [shape: f32[2,256], index: 3, kind: input, shape index: {}]   ;;  %s1112_s4 = inlined_call_operand.vmem [shape: f32[1,256], index: 4, kind: input, shape index: {}]   ;;  %s1113_s5 = inlined_call_operand.hbm [shape: f32[256,128], index: 5, kind: input, shape index: {}]   ;;  %s1114_s6 = inlined_call_operand.vmem [shape: f32[3,128], index: 6, kind: input, shape index: {}]   ;;  %s1115_s7 = inlined_call_operand.hbm [shape: f32[16,128], index: 7, kind: output, shape index: {}]  }
   0x1   :  { %13 = vsyncpa [#allocation4], 0 }
   0x2   :  { %15 = vsyncpa [#allocation4 + $0x1], 0  ;;  %s979_s24 = smov 0   ;;  %s981_s25 = smov 0  }
   0x3   :  { %s983_s26 = smov 0   ;;  %s985_s27 = smov 0  }
   0x4 LB: > { %s1000_s28 = sadd.s32 4294967295, %s932_s27   ;;  %s729_s29 = sadd.s32 4294967294, %s932_s27   ;;  %s932_s27 = sphi %s985_s27, %s1123_s27   ;;  %s928_s26 = sphi %s983_s26, %s1122_s26   ;;  %s924_s25 = sphi %s981_s25, %s1121_s25   ;;  %s920_s24 = sphi %s979_s24, %s1120_s24  }
   0x5   : > { %s1004_s30 = sadd.s32 1, %s932_s27   ;;  %s185_s8 = sadd.s32 1, %s928_s26 }
   0x6   : > { %s182_s9 = ssub.s32 %s932_s27, %s1004_s30  ;;  %p195_p0 = scmp.ne.s32.totalorder %s928_s26, %s924_s25 }
   0x7   : > { %p183_p1 = scmp.eq.s32.totalorder %s182_s9, 0  ;;  %p196_p2 = scmp.eq.s32.totalorder %s1000_s28, 1 }
   0x8   : > { %p201_p3 = scmp.ne.s32.totalorder %s924_s25, %s920_s24  ;;  %p202_p4 = scmp.eq.s32.totalorder %s729_s29, 1 }
   0x9   : > { %s1015_s10 = scalar_select %p183_p1, %s928_s26, %s185_s8  }
   0xa   : > { %p1017_p5 = por %p196_p2, %p195_p0  ;;  %p1021_p6 = por %p202_p4, %p201_p3 }
   0xb   : > { %p730_p7 = scmp.ge.s32.totalorder %s932_s27, 1  ;;  %p209_p8 = scmp.lt.s32.totalorder %s932_s27, 3 }
   0xc   : > { %s1117_s12 = scalar_select %p1021_p6, 1, 0 }
   0xd   : > { %p801_p9 = scmp.eq.s32.totalorder %s1000_s28, 0  ;;  %p1028_p10 = pnand %p730_p7, %p209_p8 }
   0xe   : > { %s934_s14 = smov [#allocation2]  }
   0xf   : > { %s230_s15 = sshll.u32 %s934_s14, 4  ;;  %p793_p11 = pneg %p1028_p10  ;;  %s231_s15 = int_to_ptr.vmem [resolvable:$true] %s230_s15 }
  0x10   : > { %s853_s16 = scalar_lea.vmem %s231_s15, 4096  ;;  %p861_p3 = scmp.lt.s32.totalorder %s231_s15, %s231_s15 }
  0x11   : > { %p794_p12 = pnand %p801_p9, %p793_p11  ;;  %p854_p0 = scmp.ne.s32.totalorder %s231_s15, %s853_s16 }
  0x12   : > { %p862_p4 = scmp.lt.s32.totalorder %s853_s16, %s853_s16 }
  0x13   : > { %p844_p13 = pneg %p794_p12 }
  0x14   : > { %p863_p6 = por %p862_p4, %p861_p3 }
  0x15   : > { %p856_p1 = pnand %p854_p0, %p844_p13 }
  0x17   : > { %p857_p2 = pneg %p856_p1 }
  0x19   : > { %p864_p7 = pnand %p863_p6, %p857_p2 }
  0x1b   : > { %867 = shalt.err (!%p864_p7)
}
  0x1c   : > { %s935_s17 = smov 128   ;;  %s936_s18 = smov 8  }
  0x1d   : > { %796 = dma.hbm_to_vmem [thread:$0]  (!%p794_p12), %s1113_s5, 4096, %s231_s15, [#allocation3], %s935_s17, %s935_s17, %s936_s18  }
  0x1e   : > { %263 = sbr.rel (%p1028_p10) target bundleno = 631 (0x277), region = 48 }
  0x23   : > { %911 = dma.done.wait (%p801_p9), [#allocation3], 4096  }
  0x24   : > { %913 = vsyncadd (%p801_p9), [#allocation3], 4294963200  ;;  %p298_p8 = scmp.lt.s32.totalorder %s1000_s28, 1  ;;  %v937_v0 = vmov 0.0   ;;  %vm324_vm0 = vcmask 1041408   ;;  %v529_v4 = vld [vmem:[#allocation2 + $0xf8] sm:$0xff]  ;;  %v484_v39 = vlaneseq }
  0x25   : > { %393 = vmatprep.mubr.f32.mxu1 %v937_v0  ;;  %v738_v1 = vld.sshfl [vmem:[%s1111_s3] sm:$0x33 pattern:$0x76325410]  ;;  %vm320_vm1 = vcmask 15360   ;;  %vm404_vm2 = vcmask 1045504   ;;  %752 = vmatprep.subr.mxu0 %v529_v4 }
  0x26   : > { %s299_s21 = scalar_select %p298_p8, %s1000_s28, 1  ;;  %v319_v2 = vcombine.high %v738_v1, %v738_v1  ;;  %v308_v5 = vld [vmem:[%s1110_s2 + $0x8] sm:$0x3f]  ;;  %v513_v6 = vld [vmem:[#allocation2 + $0x78] sm:$0xff]  ;;  %v528_v7 = vld [vmem:[#allocation2 + $0xf0] sm:$0xff]  ;;  %vm400_vm3 = vcmask 48128  }
  0x27   : > { %v307_v8 = vld [vmem:[%s1110_s2] sm:$0x3f]  ;;  %753 = vmatpush3.msra.mxu0 %v513_v6  ;;  %v512_v9 = vld [vmem:[#allocation2 + $0x70] sm:$0xff]  ;;  %v527_v10 = vld [vmem:[#allocation2 + $0xe8] sm:$0xff]  ;;  %v485_v40 = vshrl.u32 %v484_v39, 7  ;;  %s749_s17 = sshll.u32 %s1000_s28, 7 }
  0x28   : > { %s736_s22 = sshll.u32 %s299_s21, 3  ;;  %739 = vmatprep.subr.msk.mxu1 %vm324_vm0, %v319_v2  ;;  %754 = vmatprep.subr.mxu0 %v528_v7  ;;  %v511_v12 = vld [vmem:[#allocation2 + $0x68] sm:$0xff]  ;;  %v526_v13 = vld [vmem:[#allocation2 + $0xe0] sm:$0xff]  ;;  %v525_v15 = vld [vmem:[#allocation2 + $0xd8] sm:$0xff]  ;;  %s938_s13 = smov [#allocation5]  }
  0x29   : > { %s305_s8 = scalar_lea.vmem %s1109_s1, %s736_s22  ;;  %s301_s18 = scalar_lea.vmem %s1108_s0, %s736_s22  ;;  %740 = vmatpush1.msk.msra.mxu1 %vm324_vm0, %v738_v1  ;;  %755 = vmatpush3.msra.mxu0 %v512_v9  ;;  %v510_v14 = vld [vmem:[#allocation2 + $0x60] sm:$0xff]  ;;  %v509_v16 = vld [vmem:[#allocation2 + $0x58] sm:$0xff]  ;;  %v524_v17 = vld [vmem:[#allocation2 + $0xd0] sm:$0xff]  ;;  %v486_v42 = vsub.s32 0, %v485_v40  ;;  %v490_v44 = vsub.s32 1, %v485_v40 }
  0x2a   : > { %v309_v3 = vld [vmem:[%s305_s8] sm:$0xff]  ;;  %742 = vmatprep.subr.msk.mxu1 %vm404_vm2, %v308_v5  ;;  %756 = vmatprep.subr.mxu0 %v527_v10  ;;  %v508_v18 = vld [vmem:[#allocation2 + $0x50] sm:$0xff]  ;;  %v523_v19 = vld [vmem:[#allocation2 + $0xc8] sm:$0xff]  ;;  %s295_s8 = sand.u32 1, %s924_s25   ;;  %s644_s22 = scalar_lea.hbm %s1115_s7, %s749_s17 }
  0x2b   : > { %741 = vmatmul.mubr.msk.f32.vlgmr.msra.gmra.mxu1 %vm320_vm1, %v309_v3  ;;  %v306_v11 = vld [vmem:[%s301_s18] sm:$0xff]  ;;  %757 = vmatpush3.msra.mxu0 %v511_v12  ;;  %v507_v20 = vld [vmem:[#allocation2 + $0x48] sm:$0xff]  ;;  %v521_v23 = vld [vmem:[#allocation2 + $0xb8] sm:$0xff]  ;;  %s735_s9 = sshll.u32 %s295_s8, 3  ;;  %s633_s23 = scalar_lea.sflag [#allocation4], %s295_s8 }
  0x2c   : > { %743 = vmatpush1.msk.msra.mxu1 %vm404_vm2, %v307_v8  ;;  %475 = vmatprep.mubr.f32.mxu1 %v937_v0  ;;  %v522_v21 = vld [vmem:[#allocation2 + $0xc0] sm:$0xff]  ;;  %v505_v24 = vld [vmem:[#allocation2 + $0x38] sm:$0xff]  ;;  %v520_v25 = vld [vmem:[#allocation2 + $0xb0] sm:$0xff]  ;;  %s297_s18 = scalar_lea.vmem [#allocation5], %s735_s9  ;;  %s872_s14 = sshll.u32 %s938_s13, 4  ;;  %s873_s14 = int_to_ptr.vmem [resolvable:$false] %s872_s14 }
  0x2d   : > { %758 = vmatprep.subr.mxu0 %v526_v13  ;;  %v506_v22 = vld [vmem:[#allocation2 + $0x40] sm:$0xff]  ;;  %v504_v26 = vld [vmem:[#allocation2 + $0x30] sm:$0xff]  ;;  %v519_v27 = vld [vmem:[#allocation2 + $0xa8] sm:$0xff]  ;;  %s646_s19 = sshll.u32 %s297_s18, 4  ;;  %s874_s28 = scalar_lea.vmem %s873_s14, 256  ;;  %s647_s19 = int_to_ptr.vmem [resolvable:$true] %s646_s19 }
  0x2e   : > { %759 = vmatpush3.msra.mxu0 %v510_v14  ;;  %v503_v28 = vld [vmem:[#allocation2 + $0x28] sm:$0xff]  ;;  %v518_v29 = vld [vmem:[#allocation2 + $0xa0] sm:$0xff]  ;;  %v517_v31 = vld [vmem:[#allocation2 + $0x98] sm:$0xff]  ;;  %s868_s29 = scalar_lea.vmem %s647_s19, 128  ;;  %p875_p11 = scmp.lt.s32.totalorder %s647_s19, %s873_s14 }
  0x2f   : > { %744 = vmatmul.mubr.msk.f32.vlgmr.msra.gmra.mxu1 %vm400_vm3, %v306_v11  ;;  %760 = vmatprep.subr.mxu0 %v525_v15  ;;  %v502_v30 = vld [vmem:[#allocation2 + $0x20] sm:$0xff]  ;;  %v501_v32 = vld [vmem:[#allocation2 + $0x18] sm:$0xff]  ;;  %v516_v33 = vld [vmem:[#allocation2 + $0x90] sm:$0xff]  ;;  %p869_p6 = scmp.ne.s32.totalorder %s647_s19, %s868_s29  ;;  %p876_p12 = scmp.lt.s32.totalorder %s874_s28, %s868_s29 }
  0x30   : > { %761 = vmatpush3.msra.mxu0 %v509_v16  ;;  %v500_v34 = vld [vmem:[#allocation2 + $0x10] sm:$0xff]  ;;  %v515_v35 = vld [vmem:[#allocation2 + $0x88] sm:$0xff]  ;;  %v514_v37 = vld [vmem:[#allocation2 + $0x80] sm:$0xff] }
  0x31   : > { %762 = vmatprep.subr.mxu0 %v524_v17  ;;  %v499_v36 = vld [vmem:[#allocation2 + $0x8] sm:$0xff]  ;;  %v498_v38 = vld [vmem:[#allocation2] sm:$0xff]  ;;  %p870_p9 = pnand %p869_p6, %p1017_p5  ;;  %p877_p13 = por %p876_p12, %p875_p11 }
  0x32   : > { %763 = vmatpush3.msra.mxu0 %v508_v18  ;;  %v482_v43 = vld [vmem:[%s1112_s4] sm:$0x3]  ;;  %v747_v10 = vld [vmem:[%s1114_s6 + $0x2] ss:$0 sm:$0xff] }
  0x33   : > { %764 = vmatprep.subr.mxu0 %v523_v19  ;;  %v487_v47 = vrot.slane %v482_v43, %v486_v42  ;;  %v491_v49 = vrot.slane %v482_v43, %v490_v44  ;;  %v745_v57 = vld [vmem:[%s1114_s6] ss:$0 sm:$0xff]  ;;  %v746_v8 = vld [vmem:[%s1114_s6 + $0x1] ss:$0 sm:$0xff]  ;;  %p871_p10 = pneg %p870_p9 }
  0x34   : > { %765 = vmatpush3.msra.mxu0 %v507_v20 }
  0x35   : > { %766 = vmatprep.subr.mxu0 %v522_v21  ;;  %p878_p0 = pnand %p877_p13, %p871_p10 }
  0x36   : > { %767 = vmatpush3.msra.mxu0 %v506_v22 }
  0x37   : > { %768 = vmatprep.subr.mxu0 %v521_v23 }
  0x38   : > { %769 = vmatpush3.msra.mxu0 %v505_v24 }
  0x39   : > { %770 = vmatprep.subr.mxu0 %v520_v25 }
  0x3a   : > { %771 = vmatpush3.msra.mxu0 %v504_v26 }
  0x3b   : > { %772 = vmatprep.subr.mxu0 %v519_v27 }
  0x3c   : > { %773 = vmatpush3.msra.mxu0 %v503_v28 }
  0x3d   : > { %774 = vmatprep.subr.mxu0 %v518_v29 }
  0x3e   : > { %775 = vmatpush3.msra.mxu0 %v502_v30 }
  0x3f   : > { %776 = vmatprep.subr.mxu0 %v517_v31 }
  0x40   : > { %777 = vmatpush3.msra.mxu0 %v501_v32 }
  0x41   : > { %778 = vmatprep.subr.mxu0 %v516_v33 }
  0x42   : > { %779 = vmatpush3.msra.mxu0 %v500_v34 }
  0x43   : > { %780 = vmatprep.subr.mxu0 %v515_v35 }
  0x44   : > { %781 = vmatpush3.msra.mxu0 %v499_v36 }
  0x45   : > { %782 = vmatprep.subr.mxu0 %v514_v37 }
  0x46   : > { %783 = vmatpush3.msra.mxu0 %v498_v38 }
  0xeb   : > { %v395_v41 = vpop.f32.mrf.mxu1 }
  0xed   : > { %v397_v45 = vpop.f32.mrf.mxu1 }
  0xef   : > { %v477_v46 = vpop.f32.mrf.mxu1 }
  0xf0   : > { %v478_v48 = vadd.f32 %v477_v46, %v395_v41 }
  0xf1   : > { %v479_v50 = vpop.f32.mrf.mxu1 }
  0xf2   : > { %v480_v51 = vadd.f32 %v479_v50, %v397_v45  ;;  %v494_v52 = vadd.f32 %v487_v47, %v478_v48 }
  0xf4   : > { %v495_v53 = vadd.f32 %v491_v49, %v480_v51  ;;  %v496_v55 = vmax.f32 %v494_v52, 0.0 }
  0xf6   : > { %v497_v54 = vmax.f32 %v495_v53, 0.0 }
  0xf8   : > { %599 = vmatprep.mubr.f32.mxu0 %v497_v54 }
  0xf9   : > { %600 = vmatmul.mubr.f32.vlgmr.msra.gmra.mxu0 %v496_v55 }
 0x1b9   : > { %v784_v56 = vpop.f32.mrf.mxu0 }
 0x1bb   : > { %v785_v58 = vpop.f32.mrf.mxu0 }
 0x1bc   : > { %v786_v59 = vadd.f32 %v785_v58, %v784_v56 }
 0x1be   : > { %v602_v60 = vadd.f32 %v786_v59, %v745_v57 }
 0x1c0   : > { %605 = vadd.xlane.f32.xlu0 %v602_v60  ;;  %v608_v61 = vmul.f32 %v602_v60, %v602_v60 }
 0x1c4   : > { %609 = vadd.xlane.f32.xlu0 %v608_v61 }
 0x249   : > { %v606_v62 = vpop.xlane.xlu0 %605 }
 0x24a   : > { %v607_v63 = vmul.f32 0.0078125, %v606_v62 }
 0x24c   : > { %v612_v1 = vmul.f32 %v607_v63, %v607_v63  ;;  %v617_v6 = vsub.f32 %v602_v60, %v607_v63 }
 0x24d   : > { %v610_v0 = vpop.xlane.xlu0 %609 }
 0x24e   : > { %v611_v2 = vmul.f32 0.0078125, %v610_v0 }
 0x250   : > { %v613_v3 = vsub.f32 %v611_v2, %v612_v1 }
 0x252   : > { %v614_v4 = vmax.f32 %v613_v3, 0.0 }
 0x254   : > { %v615_v5 = vadd.f32 1e-05, %v614_v4 }
 0x256   : > { %840 = vrsqrt.f32 %v615_v5 }
 0x263   : > { %v841_v7 = vpop.eup %840 }
 0x264   : > { %v618_v9 = vmul.f32 %v841_v7, %v617_v6 }
 0x266   : > { %v624_v11 = vmul.f32 %v746_v8, %v618_v9 }
 0x268   : > { %v630_v12 = vadd.f32 %v747_v10, %v624_v11 }
 0x26a   : > { %631 = vst [vmem:[%s297_s18] sm:$0xff] %v630_v12 }
 0x26b   : > { %881 = shalt.err (!%p878_p0)
}
 0x26c   : > { %s882_s9 = scalar_lea.hbm %s644_s22, 128  ;;  %s886_s16 = scalar_lea.hbm %s1115_s7, 256 }
 0x26d   : > { %p883_p1 = scmp.ne.s32.totalorder %s644_s22, %s882_s9  ;;  %p887_p4 = scmp.lt.s32.totalorder %s644_s22, %s1115_s7 }
 0x26e   : > { %p888_p7 = scmp.lt.s32.totalorder %s886_s16, %s882_s9 }
 0x26f   : > { %p884_p2 = pnand %p883_p1, %p1017_p5 }
 0x270   : > { %p889_p8 = por %p888_p7, %p887_p4 }
 0x271   : > { %p885_p3 = pneg %p884_p2 }
 0x273   : > { %p890_p6 = pnand %p889_p8, %p885_p3 }
 0x275   : > { %893 = shalt.err (!%p890_p6)
}
 0x276   : > { %791 = dma.vmem_to_hbm [thread:$0]  (%p1017_p5), %s647_s19, 128, %s644_s22, %s633_s23  }
 0x277 PF: > { %p803_p9 = scmp.ge.s32.totalorder %s932_s27, 2  ;;  %s658_s20 = sand.u32 1, %s920_s24  }
 0x278   : > { %p1119_p10 = scmp.ne.s32.totalorder %s1117_s12, 0  ;;  %s659_s21 = scalar_lea.sflag [#allocation4], %s658_s20 }
 0x27a   : > { %p798_p11 = pnand %p803_p9, %p1119_p10 }
 0x27c   : > { %p799_p12 = pneg %p798_p11 }
 0x27e   : > { %915 = dma.done.wait (%p799_p12), %s659_s21, 128  }
 0x27f   : > { %917 = vsyncadd (%p799_p12), %s659_s21, 4294967168  ;;  %p18_p13 = scmp.ge.s32.totalorder %s1004_s30, 4   ;;  %s1120_s24 = smov %s924_s25 }
 0x280   : > { %s1121_s25 = smov %s928_s26  ;;  %s1122_s26 = smov %s1015_s10 }
 0x281   : > { %s1123_s27 = smov %s1004_s30  ;;  %20 = sbr.rel (!%p18_p13) target bundleno = 4 (0x4), region = 91 }
 0x286   :  { %664 = vsyncpa [#allocation3], 1 }
 0x287   :  { %666 = vsyncpa [#allocation3 + $0x1], 1 }
 0x288   :  { %667 = vsyncpa [#allocation4], 1 }
 0x289   :  { %669 = vsyncpa [#allocation4 + $0x1], 1 }

</bundles_post_ra>
